<compile_context>
chip_gen: v5e
topology: v5e:2x2
jax: 0.10.0
libtpu: 0.0.40
codegen_flags: <defaults>
</compile_context>

<pallas_src>
import jax
import jax.numpy as jnp
from jax.experimental import pallas as pl
from jax.experimental.pallas import tpu as pltpu

PACK = 8  # f32 sublane height: pack 8 batch rows per lane-row


def mlp_packed_kernel(x_ref, w1_ref, b1_ref, w2_ref, b2_ref, o_ref):
    # x_ref:  (tile_rows, PACK*n_in)   -- 8 batch rows packed per lane-row
    # w1_ref: (PACK*n_in, PACK*n_hid)  -- blockdiag(W1.T x8), VMEM-resident
    # w2_ref: (PACK*n_hid, PACK*n_out) -- blockdiag(W2.T x8), VMEM-resident
    # Plain (M,K)x(K,N) contractions -> straight MXU, no transposed-RHS handling.
    h = jnp.dot(x_ref[...], w1_ref[...], preferred_element_type=jnp.float32)
    h = jnp.tanh(h + b1_ref[...])
    y = jnp.dot(h, w2_ref[...], preferred_element_type=jnp.float32)
    o_ref[...] = (y + b2_ref[...]).astype(o_ref.dtype)


def _block_diag(w, reps):
    """blockdiag(w, w, ..., w) with `reps` copies; w: (k, n) -> (reps*k, reps*n)."""
    k, n = w.shape
    eye = jnp.eye(reps, dtype=w.dtype)
    return (eye[:, None, :, None] * w[None, :, None, :]).reshape(reps * k, reps * n)


def prepare_params(w_hid, b_hid, w_out, b_out):
    """One-time (init-time) packing of PyTorch-layout Linear params.

    w_hid: (n_hid, n_in), b_hid: (n_hid,), w_out: (n_out, n_hid), b_out: (n_out,)
    Returns lane-dense block-diagonal weights + tiled biases for the kernel.
    """
    w1_bd = _block_diag(w_hid.T, PACK)           # (PACK*n_in,  PACK*n_hid)
    w2_bd = _block_diag(w_out.T, PACK)           # (PACK*n_hid, PACK*n_out)
    b1_t = jnp.tile(b_hid, PACK).reshape(1, -1)  # (1, PACK*n_hid)
    b2_t = jnp.tile(b_out, PACK).reshape(1, -1)  # (1, PACK*n_out)
    return w1_bd, b1_t, w2_bd, b2_t


def net_forward(x, packed_params, *, tb_max=8192):
    """Pallas equivalent of Net.forward (PyTorch Linear semantics).

    x: (B, n_in) float32; packed_params from prepare_params().
    """
    w1_bd, b1_t, w2_bd, b2_t = packed_params
    B, n_in = x.shape
    n_hid = b1_t.shape[1] // PACK
    n_out = b2_t.shape[1] // PACK
    assert w1_bd.shape == (PACK * n_in, PACK * n_hid)
    assert w2_bd.shape == (PACK * n_hid, PACK * n_out)

    # Pad batch to a multiple of PACK so the 8-rows-per-lane-row packing is a
    # free row-major reinterpretation. Padded rows are sliced off at the end.
    B_pad = ((B + PACK - 1) // PACK) * PACK
    if B_pad != B:
        x = jnp.pad(x, ((0, B_pad - B), (0, 0)))
    rows = B_pad // PACK
    x_packed = x.reshape(rows, PACK * n_in)      # free row-major view

    # Batch tile in packed rows: big enough to amortize per-grid-step overhead,
    # small enough for v5e's 16 MiB default scoped VMEM (double-buffered x/out
    # + resident block-diag weights + hidden tile ~= 6.5 MiB at 1024 rows).
    tile_rows = min(tb_max // PACK, rows)
    # Keep >=2 grid steps when there is enough work so the "parallel" batch
    # axis actually feeds both v7x TensorCores (no effect on v5e/v6e).
    if tile_rows == rows and rows >= 16:
        tile_rows = (((rows + 1) // 2) + PACK - 1) // PACK * PACK
    grid = (pl.cdiv(rows, tile_rows),)

    resident = lambda shape: pl.BlockSpec(shape, lambda i: (0, 0))

    cost = pl.CostEstimate(
        flops=2 * B_pad * (n_in * n_hid + n_hid * n_out),
        transcendentals=B_pad * n_hid,
        bytes_accessed=4 * (B_pad * (n_in + n_out)
                            + w1_bd.size + w2_bd.size + b1_t.size + b2_t.size),
    )

    y_packed = pl.pallas_call(
        mlp_packed_kernel,
        out_shape=jax.ShapeDtypeStruct((rows, PACK * n_out), x.dtype),
        grid=grid,
        in_specs=[
            pl.BlockSpec((tile_rows, PACK * n_in), lambda i: (i, 0)),  # x: batch-tiled
            resident((PACK * n_in, PACK * n_hid)),                     # W1_bd (VMEM-resident)
            resident((1, PACK * n_hid)),                               # b1 (tiled x8)
            resident((PACK * n_hid, PACK * n_out)),                    # W2_bd (VMEM-resident)
            resident((1, PACK * n_out)),                               # b2 (tiled x8)
        ],
        out_specs=pl.BlockSpec((tile_rows, PACK * n_out), lambda i: (i, 0)),
        compiler_params=pltpu.CompilerParams(
            dimension_semantics=("parallel",),   # v7x: split batch over 2 TCs
        ),
        cost_estimate=cost,
    )(x_packed, w1_bd, b1_t, w2_bd, b2_t)

    # Free reshape back to (B_pad, n_out), then drop padded rows.
    y = y_packed.reshape(B_pad, n_out)
    return y[:B] if B_pad != B else y


if __name__ == "__main__":
    # Small shapes consistent with Net(N_IN, N_HID, N_OUT); B=20 also exercises
    # the ragged-batch (pad-to-multiple-of-8) path.
    B, N_IN, N_HID, N_OUT = 20, 32, 64, 16

    key = jax.random.PRNGKey(0)
    kx, kw1, kb1, kw2, kb2 = jax.random.split(key, 5)

    x = jax.random.normal(kx, (B, N_IN), dtype=jnp.float32)

    # Deterministic parameter init (PyTorch Linear shapes: weight (out, in), bias (out,))
    bound1 = 1.0 / (N_IN ** 0.5)
    w_hid = jax.random.uniform(kw1, (N_HID, N_IN), minval=-bound1, maxval=bound1, dtype=jnp.float32)
    b_hid = jax.random.uniform(kb1, (N_HID,), minval=-bound1, maxval=bound1, dtype=jnp.float32)
    bound2 = 1.0 / (N_HID ** 0.5)
    w_out = jax.random.uniform(kw2, (N_OUT, N_HID), minval=-bound2, maxval=bound2, dtype=jnp.float32)
    b_out = jax.random.uniform(kb2, (N_OUT,), minval=-bound2, maxval=bound2, dtype=jnp.float32)

    # Init-time packing (transpose + block-diag done once, not per forward).
    params = prepare_params(w_hid, b_hid, w_out, b_out)

    y = net_forward(x, params)
    y = jax.block_until_ready(y)

    # Pure-JAX reference check (PyTorch Linear semantics)
    ref = jnp.tanh(x @ w_hid.T + b_hid) @ w_out.T + b_out
    assert y.shape == (B, N_OUT)
    assert jnp.allclose(y, ref, atol=1e-5, rtol=1e-5)

    print("KERNEL_OK")
</pallas_src>

<mosaic_0001>
module attributes {stable_mosaic.version = 11 : i64} {
  func.func @mlp_packed_kernel(%arg0: i32, %arg1: memref<3x256xf32, #tpu.memory_space<vmem>>, %arg2: memref<256x512xf32, #tpu.memory_space<vmem>>, %arg3: memref<1x512xf32, #tpu.memory_space<vmem>>, %arg4: memref<512x128xf32, #tpu.memory_space<vmem>>, %arg5: memref<1x128xf32, #tpu.memory_space<vmem>>, %arg6: memref<3x128xf32, #tpu.memory_space<vmem>>) attributes {dimension_semantics = [#tpu.dimension_semantics<parallel>], iteration_bounds = array<i64: 1>, scalar_prefetch = 0 : i64, scratch_operands = 0 : i64, tpu.core_type = #tpu.core_type<tc>, window_params = [{transform_indices = @transform_0, window_bounds = array<i64: 3, 256>}, {pipeline_mode = #tpu.pipeline_mode<synchronous>, transform_indices = @transform_1, window_bounds = array<i64: 256, 512>}, {pipeline_mode = #tpu.pipeline_mode<synchronous>, transform_indices = @transform_2, window_bounds = array<i64: 1, 512>}, {pipeline_mode = #tpu.pipeline_mode<synchronous>, transform_indices = @transform_3, window_bounds = array<i64: 512, 128>}, {pipeline_mode = #tpu.pipeline_mode<synchronous>, transform_indices = @transform_4, window_bounds = array<i64: 1, 128>}, {transform_indices = @transform_5, window_bounds = array<i64: 3, 128>}]} {
    %c0 = arith.constant 0 : index
    %c0_0 = arith.constant 0 : index
    %0 = vector.load %arg1[%c0, %c0_0] : memref<3x256xf32, #tpu.memory_space<vmem>>, vector<3x256xf32>
    %c0_1 = arith.constant 0 : index
    %c0_2 = arith.constant 0 : index
    %1 = vector.load %arg2[%c0_1, %c0_2] : memref<256x512xf32, #tpu.memory_space<vmem>>, vector<256x512xf32>
    %cst = arith.constant dense<0.000000e+00> : vector<3x512xf32>
    %2 = tpu.matmul %0, %1, %cst {dimension_numbers = #tpu.dot_dimension_numbers<[1], [0], [0], [1], [0, 0, 1, 1], [], []>} : vector<3x256xf32>, vector<256x512xf32>, vector<3x512xf32> -> vector<3x512xf32>
    %c0_3 = arith.constant 0 : index
    %c0_4 = arith.constant 0 : index
    %3 = vector.load %arg3[%c0_3, %c0_4] : memref<1x512xf32, #tpu.memory_space<vmem>>, vector<1x512xf32>
    %4 = vector.broadcast %3 : vector<1x512xf32> to vector<3x512xf32>
    %5 = arith.addf %2, %4 : vector<3x512xf32>
    %6 = math.tanh %5 : vector<3x512xf32>
    %c0_5 = arith.constant 0 : index
    %c0_6 = arith.constant 0 : index
    %7 = vector.load %arg4[%c0_5, %c0_6] : memref<512x128xf32, #tpu.memory_space<vmem>>, vector<512x128xf32>
    %cst_7 = arith.constant dense<0.000000e+00> : vector<3x128xf32>
    %8 = tpu.matmul %6, %7, %cst_7 {dimension_numbers = #tpu.dot_dimension_numbers<[1], [0], [0], [1], [0, 0, 1, 1], [], []>} : vector<3x512xf32>, vector<512x128xf32>, vector<3x128xf32> -> vector<3x128xf32>
    %c0_8 = arith.constant 0 : index
    %c0_9 = arith.constant 0 : index
    %9 = vector.load %arg5[%c0_8, %c0_9] : memref<1x128xf32, #tpu.memory_space<vmem>>, vector<1x128xf32>
    %10 = vector.broadcast %9 : vector<1x128xf32> to vector<3x128xf32>
    %11 = arith.addf %8, %10 : vector<3x128xf32>
    %c0_10 = arith.constant 0 : index
    %c0_11 = arith.constant 0 : index
    %12 = vector.load %arg6[%c0_10, %c0_11] : memref<3x128xf32, #tpu.memory_space<vmem>>, vector<3x128xf32>
    tpu.vector_store %arg6[%c0_10, %c0_11], %11 {strides = array<i32>} : memref<3x128xf32, #tpu.memory_space<vmem>>, vector<3x128xf32>,
    return
  }
  func.func @transform_0(%arg0: i32) -> (i32, i32) {
    %c0_i32 = arith.constant 0 : i32
    %c0_i32_0 = arith.constant 0 : i32
    return %arg0, %c0_i32 : i32, i32
  }
  func.func @transform_1(%arg0: i32) -> (i32, i32) {
    %c0_i32 = arith.constant 0 : i32
    %c0_i32_0 = arith.constant 0 : i32
    %c0_i32_1 = arith.constant 0 : i32
    return %c0_i32, %c0_i32_0 : i32, i32
  }
  func.func @transform_2(%arg0: i32) -> (i32, i32) {
    %c0_i32 = arith.constant 0 : i32
    %c0_i32_0 = arith.constant 0 : i32
    %c0_i32_1 = arith.constant 0 : i32
    return %c0_i32, %c0_i32_0 : i32, i32
  }
  func.func @transform_3(%arg0: i32) -> (i32, i32) {
    %c0_i32 = arith.constant 0 : i32
    %c0_i32_0 = arith.constant 0 : i32
    %c0_i32_1 = arith.constant 0 : i32
    return %c0_i32, %c0_i32_0 : i32, i32
  }
  func.func @transform_4(%arg0: i32) -> (i32, i32) {
    %c0_i32 = arith.constant 0 : i32
    %c0_i32_0 = arith.constant 0 : i32
    %c0_i32_1 = arith.constant 0 : i32
    return %c0_i32, %c0_i32_0 : i32, i32
  }
  func.func @transform_5(%arg0: i32) -> (i32, i32) {
    %c0_i32 = arith.constant 0 : i32
    %c0_i32_0 = arith.constant 0 : i32
    return %arg0, %c0_i32 : i32, i32
  }
}

</mosaic_0001>

<bundles_post_ra>
// kernel: tpu_custom_call.1
= control target key start
LH: loop header
LB: loop body
LE: loop exit
PB: predicated region body
PF: predicated region fallthrough
CT: control target
= control target key end

     0   :  { %10 = vsyncpa [#allocation3], 0  ;;  %s760_s0 = inlined_call_operand.hbm [shape: f32[3,256], index: 0, kind: input, shape index: {}]   ;;  %s761_s1 = inlined_call_operand.hbm [shape: f32[256,512], index: 1, kind: input, shape index: {}]   ;;  %s762_s2 = inlined_call_operand.hbm [shape: f32[1,512], index: 2, kind: input, shape index: {}]   ;;  %s763_s3 = inlined_call_operand.hbm [shape: f32[512,128], index: 3, kind: input, shape index: {}]   ;;  %s764_s4 = inlined_call_operand.vmem [shape: f32[1,128], index: 4, kind: input, shape index: {}]   ;;  %s765_s5 = inlined_call_operand.hbm [shape: f32[3,128], index: 5, kind: output, shape index: {}]  }
   0x1   :  { %11 = vsyncpa [#allocation6], 0 }
   0x2   :  { %12 = vsyncpa [#allocation9], 0  ;;  %s29_s20 = sshll.u32 %s761_s1, 4  ;;  %s30_s20 = int_to_ptr.hbm [resolvable:$true] %s29_s20 }
   0x3   :  { %13 = vsyncpa [#allocation4], 0  ;;  %s703_s21 = smov [#allocation5]   ;;  %s19_s25 = sshll.u32 %s760_s0, 4  ;;  %s20_s25 = int_to_ptr.hbm [resolvable:$true] %s19_s25 }
   0x4   :  { %s31_s22 = sshll.u32 %s703_s21, 4  ;;  %s704_s26 = smov 512   ;;  %s32_s22 = int_to_ptr.vmem [resolvable:$true] %s31_s22 }
   0x5   :  { %s705_s27 = smov 32   ;;  %s706_s28 = smov [#allocation2]  }
   0x6   :  { %37 = dma.hbm_to_vmem [thread:$0]  %s30_s20, 16384, %s32_s22, [#allocation6], %s704_s26, %s704_s26, %s705_s27  }
   0x7   :  { %s21_s29 = sshll.u32 %s706_s28, 4  ;;  %s43_s7 = sshll.u32 %s762_s2, 4  ;;  %s22_s29 = int_to_ptr.vmem [resolvable:$true] %s21_s29  ;;  %s44_s7 = int_to_ptr.hbm [resolvable:$true] %s43_s7 }
   0x8   :  { %24 = dma.hbm_to_vmem [thread:$0]  %s20_s25, 128, %s22_s29, [#allocation3]  }
   0x9   :  { %s53_s9 = sshll.u32 %s763_s3, 4  ;;  %s707_s10 = smov [#allocation7]   ;;  %s54_s9 = int_to_ptr.hbm [resolvable:$true] %s53_s9 }
   0xa   :  { %s45_s11 = sshll.u32 %s707_s10, 4  ;;  %s708_s0 = smov [#allocation8]   ;;  %s46_s11 = int_to_ptr.vmem [resolvable:$true] %s45_s11 }
   0xb   :  { %48 = dma.hbm_to_vmem [thread:$0]  %s44_s7, 64, %s46_s11, [#allocation6]  }
   0xc   :  { %s55_s12 = sshll.u32 %s708_s0, 4  ;;  %s709_s13 = smov 128   ;;  %s56_s12 = int_to_ptr.vmem [resolvable:$true] %s55_s12 }
   0xd   :  { %s710_s14 = smov 8  }
   0xe   :  { %61 = dma.hbm_to_vmem [thread:$0]  %s54_s9, 8192, %s56_s12, [#allocation9], %s709_s13, %s709_s13, %s710_s14  }
   0xf   :  { %695 = dma.done.wait [#allocation3], 128  }
  0x10   :  { %696 = vsyncadd [#allocation3], 4294967168 }
  0x11   :  { %697 = dma.done.wait [#allocation6], 16448  }
  0x12   :  { %698 = vsyncadd [#allocation6], 4294950848 }
  0x13   :  { %699 = dma.done.wait [#allocation9], 8192  }
  0x14   :  { %700 = vsyncadd [#allocation9], 4294959104  ;;  %v141_v0 = vld [vmem:[#allocation5 + $0x1e0] sm:$0xff]  ;;  %v142_v1 = vld [vmem:[#allocation5 + $0x1e8] sm:$0xff]  ;;  %s711_s15 = smov [#allocation10]   ;;  %s545_s19 = sshll.u32 %s765_s5, 4  ;;  %s546_s19 = int_to_ptr.hbm [resolvable:$true] %s545_s19 }
  0x15   :  { %v137_v2 = vld [vmem:[#allocation5 + $0x1c0] sm:$0xff]  ;;  %225 = vmatpush.msra.mxu0 %v141_v0  ;;  %265 = vmatpush.msra.mxu2 %v142_v1  ;;  %v138_v4 = vld [vmem:[#allocation5 + $0x1c8] sm:$0xff]  ;;  %v143_v62 = vld [vmem:[#allocation5 + $0x1f0] sm:$0xff]  ;;  %s543_s16 = sshll.u32 %s711_s15, 4  ;;  %s544_s16 = int_to_ptr.vmem [resolvable:$true] %s543_s16 }
  0x16   :  { %v205_v3 = vld [vmem:[#allocation5 + $0x3e0] sm:$0xff]  ;;  %v206_v5 = vld [vmem:[#allocation5 + $0x3e8] sm:$0xff]  ;;  %v144_v63 = vld [vmem:[#allocation5 + $0x1f8] sm:$0xff] }
  0x17   :  { %245 = vmatpush.msra.mxu1 %v205_v3  ;;  %285 = vmatpush.msra.mxu3 %v206_v5  ;;  %v133_v6 = vld [vmem:[#allocation5 + $0x1a0] sm:$0xff]  ;;  %v134_v8 = vld [vmem:[#allocation5 + $0x1a8] sm:$0xff]  ;;  %v207_v3 = vld [vmem:[#allocation5 + $0x3f0] sm:$0xff] }
  0x18   :  { %v201_v7 = vld [vmem:[#allocation5 + $0x3c0] sm:$0xff]  ;;  %226 = vmatpush.msra.mxu0 %v137_v2  ;;  %266 = vmatpush.msra.mxu2 %v138_v4  ;;  %v202_v9 = vld [vmem:[#allocation5 + $0x3c8] sm:$0xff]  ;;  %v139_v2 = vld [vmem:[#allocation5 + $0x1d0] sm:$0xff] }
  0x19   :  { %v197_v10 = vld [vmem:[#allocation5 + $0x3a0] sm:$0xff]  ;;  %246 = vmatpush.msra.mxu1 %v201_v7  ;;  %286 = vmatpush.msra.mxu3 %v202_v9  ;;  %v130_v12 = vld [vmem:[#allocation5 + $0x188] sm:$0xff]  ;;  %v140_v4 = vld [vmem:[#allocation5 + $0x1d8] sm:$0xff] }
  0x1a   :  { %v129_v11 = vld [vmem:[#allocation5 + $0x180] sm:$0xff]  ;;  %v198_v13 = vld [vmem:[#allocation5 + $0x3a8] sm:$0xff]  ;;  %227 = vmatpush.msra.mxu0 %v133_v6  ;;  %267 = vmatpush.msra.mxu2 %v134_v8  ;;  %v208_v5 = vld [vmem:[#allocation5 + $0x3f8] sm:$0xff] }
  0x1b   :  { %v193_v14 = vld [vmem:[#allocation5 + $0x380] sm:$0xff]  ;;  %v194_v15 = vld [vmem:[#allocation5 + $0x388] sm:$0xff]  ;;  %247 = vmatpush.msra.mxu1 %v197_v10  ;;  %287 = vmatpush.msra.mxu3 %v198_v13  ;;  %v135_v6 = vld [vmem:[#allocation5 + $0x1b0] sm:$0xff] }
  0x1c   :  { %v125_v16 = vld [vmem:[#allocation5 + $0x160] sm:$0xff]  ;;  %v126_v17 = vld [vmem:[#allocation5 + $0x168] sm:$0xff]  ;;  %228 = vmatpush.msra.mxu0 %v129_v11  ;;  %268 = vmatpush.msra.mxu2 %v130_v12  ;;  %v203_v7 = vld [vmem:[#allocation5 + $0x3d0] sm:$0xff] }
  0x1d   :  { %v189_v18 = vld [vmem:[#allocation5 + $0x360] sm:$0xff]  ;;  %v190_v19 = vld [vmem:[#allocation5 + $0x368] sm:$0xff]  ;;  %248 = vmatpush.msra.mxu1 %v193_v14  ;;  %288 = vmatpush.msra.mxu3 %v194_v15  ;;  %v136_v8 = vld [vmem:[#allocation5 + $0x1b8] sm:$0xff] }
  0x1e   :  { %v121_v20 = vld [vmem:[#allocation5 + $0x140] sm:$0xff]  ;;  %v122_v21 = vld [vmem:[#allocation5 + $0x148] sm:$0xff]  ;;  %229 = vmatpush.msra.mxu0 %v125_v16  ;;  %269 = vmatpush.msra.mxu2 %v126_v17  ;;  %v204_v9 = vld [vmem:[#allocation5 + $0x3d8] sm:$0xff] }
  0x1f   :  { %v185_v22 = vld [vmem:[#allocation5 + $0x340] sm:$0xff]  ;;  %v186_v23 = vld [vmem:[#allocation5 + $0x348] sm:$0xff]  ;;  %249 = vmatpush.msra.mxu1 %v189_v18  ;;  %289 = vmatpush.msra.mxu3 %v190_v19  ;;  %v131_v10 = vld [vmem:[#allocation5 + $0x190] sm:$0xff] }
  0x20   :  { %v117_v24 = vld [vmem:[#allocation5 + $0x120] sm:$0xff]  ;;  %v118_v25 = vld [vmem:[#allocation5 + $0x128] sm:$0xff]  ;;  %230 = vmatpush.msra.mxu0 %v121_v20  ;;  %270 = vmatpush.msra.mxu2 %v122_v21  ;;  %v199_v11 = vld [vmem:[#allocation5 + $0x3b0] sm:$0xff] }
  0x21   :  { %v181_v26 = vld [vmem:[#allocation5 + $0x320] sm:$0xff]  ;;  %v182_v27 = vld [vmem:[#allocation5 + $0x328] sm:$0xff]  ;;  %250 = vmatpush.msra.mxu1 %v185_v22  ;;  %290 = vmatpush.msra.mxu3 %v186_v23  ;;  %v132_v12 = vld [vmem:[#allocation5 + $0x198] sm:$0xff] }
  0x22   :  { %v113_v28 = vld [vmem:[#allocation5 + $0x100] sm:$0xff]  ;;  %v114_v29 = vld [vmem:[#allocation5 + $0x108] sm:$0xff]  ;;  %231 = vmatpush.msra.mxu0 %v117_v24  ;;  %271 = vmatpush.msra.mxu2 %v118_v25  ;;  %v200_v13 = vld [vmem:[#allocation5 + $0x3b8] sm:$0xff] }
  0x23   :  { %v177_v30 = vld [vmem:[#allocation5 + $0x300] sm:$0xff]  ;;  %v178_v31 = vld [vmem:[#allocation5 + $0x308] sm:$0xff]  ;;  %251 = vmatpush.msra.mxu1 %v181_v26  ;;  %291 = vmatpush.msra.mxu3 %v182_v27  ;;  %v80_v14 = vld [vmem:[#allocation2] sm:$0x77] }
  0x24   :  { %v109_v32 = vld [vmem:[#allocation5 + $0xe0] sm:$0xff]  ;;  %v110_v33 = vld [vmem:[#allocation5 + $0xe8] sm:$0xff]  ;;  %232 = vmatpush.msra.mxu0 %v113_v28  ;;  %272 = vmatpush.msra.mxu2 %v114_v29  ;;  %v127_v15 = vld [vmem:[#allocation5 + $0x170] sm:$0xff]  ;;  %220 = vst [vmem:[#allocation1] ss:$2 sm:$0xff] %v80_v14 }
  0x25   :  { %v173_v34 = vld [vmem:[#allocation5 + $0x2e0] sm:$0xff]  ;;  %v174_v35 = vld [vmem:[#allocation5 + $0x2e8] sm:$0xff]  ;;  %252 = vmatpush.msra.mxu1 %v177_v30  ;;  %292 = vmatpush.msra.mxu3 %v178_v31  ;;  %v195_v16 = vld [vmem:[#allocation5 + $0x390] sm:$0xff] }
  0x26   :  { %v105_v36 = vld [vmem:[#allocation5 + $0xc0] sm:$0xff]  ;;  %v106_v37 = vld [vmem:[#allocation5 + $0xc8] sm:$0xff]  ;;  %233 = vmatpush.msra.mxu0 %v109_v32  ;;  %273 = vmatpush.msra.mxu2 %v110_v33  ;;  %v128_v17 = vld [vmem:[#allocation5 + $0x178] sm:$0xff] }
  0x27   :  { %v169_v38 = vld [vmem:[#allocation5 + $0x2c0] sm:$0xff]  ;;  %v170_v39 = vld [vmem:[#allocation5 + $0x2c8] sm:$0xff]  ;;  %253 = vmatpush.msra.mxu1 %v173_v34  ;;  %293 = vmatpush.msra.mxu3 %v174_v35  ;;  %v196_v18 = vld [vmem:[#allocation5 + $0x398] sm:$0xff] }
  0x28   :  { %v101_v40 = vld [vmem:[#allocation5 + $0xa0] sm:$0xff]  ;;  %v102_v41 = vld [vmem:[#allocation5 + $0xa8] sm:$0xff]  ;;  %234 = vmatpush.msra.mxu0 %v105_v36  ;;  %274 = vmatpush.msra.mxu2 %v106_v37  ;;  %v123_v19 = vld [vmem:[#allocation5 + $0x150] sm:$0xff] }
  0x29   :  { %v165_v42 = vld [vmem:[#allocation5 + $0x2a0] sm:$0xff]  ;;  %v166_v43 = vld [vmem:[#allocation5 + $0x2a8] sm:$0xff]  ;;  %254 = vmatpush.msra.mxu1 %v169_v38  ;;  %294 = vmatpush.msra.mxu3 %v170_v39  ;;  %v191_v20 = vld [vmem:[#allocation5 + $0x370] sm:$0xff] }
  0x2a   :  { %v97_v44 = vld [vmem:[#allocation5 + $0x80] sm:$0xff]  ;;  %v98_v45 = vld [vmem:[#allocation5 + $0x88] sm:$0xff]  ;;  %235 = vmatpush.msra.mxu0 %v101_v40  ;;  %275 = vmatpush.msra.mxu2 %v102_v41  ;;  %v124_v21 = vld [vmem:[#allocation5 + $0x158] sm:$0xff] }
  0x2b   :  { %v161_v46 = vld [vmem:[#allocation5 + $0x280] sm:$0xff]  ;;  %v162_v47 = vld [vmem:[#allocation5 + $0x288] sm:$0xff]  ;;  %255 = vmatpush.msra.mxu1 %v165_v42  ;;  %295 = vmatpush.msra.mxu3 %v166_v43  ;;  %v192_v22 = vld [vmem:[#allocation5 + $0x378] sm:$0xff] }
  0x2c   :  { %v93_v48 = vld [vmem:[#allocation5 + $0x60] sm:$0xff]  ;;  %v94_v49 = vld [vmem:[#allocation5 + $0x68] sm:$0xff]  ;;  %236 = vmatpush.msra.mxu0 %v97_v44  ;;  %276 = vmatpush.msra.mxu2 %v98_v45  ;;  %v119_v23 = vld [vmem:[#allocation5 + $0x130] sm:$0xff] }
  0x2d   :  { %v157_v50 = vld [vmem:[#allocation5 + $0x260] sm:$0xff]  ;;  %v158_v51 = vld [vmem:[#allocation5 + $0x268] sm:$0xff]  ;;  %256 = vmatpush.msra.mxu1 %v161_v46  ;;  %296 = vmatpush.msra.mxu3 %v162_v47  ;;  %v187_v24 = vld [vmem:[#allocation5 + $0x350] sm:$0xff] }
  0x2e   :  { %v89_v52 = vld [vmem:[#allocation5 + $0x40] sm:$0xff]  ;;  %v90_v53 = vld [vmem:[#allocation5 + $0x48] sm:$0xff]  ;;  %237 = vmatpush.msra.mxu0 %v93_v48  ;;  %277 = vmatpush.msra.mxu2 %v94_v49  ;;  %v120_v25 = vld [vmem:[#allocation5 + $0x138] sm:$0xff] }
  0x2f   :  { %v153_v54 = vld [vmem:[#allocation5 + $0x240] sm:$0xff]  ;;  %v154_v55 = vld [vmem:[#allocation5 + $0x248] sm:$0xff]  ;;  %257 = vmatpush.msra.mxu1 %v157_v50  ;;  %297 = vmatpush.msra.mxu3 %v158_v51  ;;  %v188_v26 = vld [vmem:[#allocation5 + $0x358] sm:$0xff] }
  0x30   :  { %v85_v56 = vld [vmem:[#allocation5 + $0x20] sm:$0xff]  ;;  %v86_v57 = vld [vmem:[#allocation5 + $0x28] sm:$0xff]  ;;  %238 = vmatpush.msra.mxu0 %v89_v52  ;;  %278 = vmatpush.msra.mxu2 %v90_v53  ;;  %v115_v27 = vld [vmem:[#allocation5 + $0x110] sm:$0xff] }
  0x31   :  { %v149_v58 = vld [vmem:[#allocation5 + $0x220] sm:$0xff]  ;;  %v150_v59 = vld [vmem:[#allocation5 + $0x228] sm:$0xff]  ;;  %258 = vmatpush.msra.mxu1 %v153_v54  ;;  %298 = vmatpush.msra.mxu3 %v154_v55  ;;  %v183_v28 = vld [vmem:[#allocation5 + $0x330] sm:$0xff] }
  0x32   :  { %v81_v60 = vld [vmem:[#allocation5] sm:$0xff]  ;;  %v82_v61 = vld [vmem:[#allocation5 + $0x8] sm:$0xff]  ;;  %239 = vmatpush.msra.mxu0 %v85_v56  ;;  %279 = vmatpush.msra.mxu2 %v86_v57  ;;  %v116_v29 = vld [vmem:[#allocation5 + $0x118] sm:$0xff] }
  0x33   :  { %259 = vmatpush.msra.mxu1 %v149_v58  ;;  %299 = vmatpush.msra.mxu3 %v150_v59  ;;  %v145_v0 = vld [vmem:[#allocation5 + $0x200] sm:$0xff]  ;;  %v146_v1 = vld [vmem:[#allocation5 + $0x208] sm:$0xff]  ;;  %v184_v30 = vld [vmem:[#allocation5 + $0x338] sm:$0xff] }
  0x34   :  { %240 = vmatpush.msra.mxu0 %v81_v60  ;;  %280 = vmatpush.msra.mxu2 %v82_v61  ;;  %v111_v31 = vld [vmem:[#allocation5 + $0xf0] sm:$0xff]  ;;  %v112_v33 = vld [vmem:[#allocation5 + $0xf8] sm:$0xff] }
  0x35   :  { %260 = vmatpush.msra.mxu1 %v145_v0  ;;  %300 = vmatpush.msra.mxu3 %v146_v1  ;;  %v179_v32 = vld [vmem:[#allocation5 + $0x310] sm:$0xff]  ;;  %v180_v34 = vld [vmem:[#allocation5 + $0x318] sm:$0xff] }
  0x36   :  { %305 = vmatpush.msrb.mxu0 %v143_v62  ;;  %345 = vmatpush.msrb.mxu2 %v144_v63  ;;  %v107_v35 = vld [vmem:[#allocation5 + $0xd0] sm:$0xff]  ;;  %v108_v37 = vld [vmem:[#allocation5 + $0xd8] sm:$0xff] }
  0x37   :  { %325 = vmatpush.msrb.mxu1 %v207_v3  ;;  %365 = vmatpush.msrb.mxu3 %v208_v5  ;;  %v175_v36 = vld [vmem:[#allocation5 + $0x2f0] sm:$0xff]  ;;  %v176_v38 = vld [vmem:[#allocation5 + $0x2f8] sm:$0xff] }
  0x38   :  { %306 = vmatpush.msrb.mxu0 %v139_v2  ;;  %346 = vmatpush.msrb.mxu2 %v140_v4  ;;  %v103_v39 = vld [vmem:[#allocation5 + $0xb0] sm:$0xff]  ;;  %v104_v41 = vld [vmem:[#allocation5 + $0xb8] sm:$0xff] }
  0x39   :  { %326 = vmatpush.msrb.mxu1 %v203_v7  ;;  %366 = vmatpush.msrb.mxu3 %v204_v9  ;;  %v171_v40 = vld [vmem:[#allocation5 + $0x2d0] sm:$0xff]  ;;  %v172_v42 = vld [vmem:[#allocation5 + $0x2d8] sm:$0xff] }
  0x3a   :  { %307 = vmatpush.msrb.mxu0 %v135_v6  ;;  %347 = vmatpush.msrb.mxu2 %v136_v8  ;;  %v99_v43 = vld [vmem:[#allocation5 + $0x90] sm:$0xff]  ;;  %v100_v45 = vld [vmem:[#allocation5 + $0x98] sm:$0xff] }
  0x3b   :  { %327 = vmatpush.msrb.mxu1 %v199_v11  ;;  %367 = vmatpush.msrb.mxu3 %v200_v13  ;;  %v167_v44 = vld [vmem:[#allocation5 + $0x2b0] sm:$0xff]  ;;  %v168_v46 = vld [vmem:[#allocation5 + $0x2b8] sm:$0xff] }
  0x3c   :  { %308 = vmatpush.msrb.mxu0 %v131_v10  ;;  %348 = vmatpush.msrb.mxu2 %v132_v12  ;;  %v221_v47 = vld.sshfl [vmem:[#allocation1] sm:$0xff pattern:$0x75316420]  ;;  %v96_v50 = vld [vmem:[#allocation5 + $0x78] sm:$0xff] }
  0x3d   :  { %328 = vmatpush.msrb.mxu1 %v195_v16  ;;  %368 = vmatpush.msrb.mxu3 %v196_v18  ;;  %v95_v48 = vld [vmem:[#allocation5 + $0x70] sm:$0xff]  ;;  %v164_v51 = vld [vmem:[#allocation5 + $0x298] sm:$0xff]  ;;  %v417_v16 = vld [vmem:[#allocation8 + $0xe0] sm:$0xff] }
  0x3e   :  { %309 = vmatpush.msrb.mxu0 %v127_v15  ;;  %349 = vmatpush.msrb.mxu2 %v128_v17  ;;  %v163_v49 = vld [vmem:[#allocation5 + $0x290] sm:$0xff]  ;;  %v222_v52 = vld.sshfl [vmem:[#allocation1 + $0x8] sm:$0xff pattern:$0x75316420]  ;;  %v401_v15 = vld [vmem:[#allocation8 + $0x60] sm:$0xff] }
  0x3f   :  { %329 = vmatpush.msrb.mxu1 %v191_v20  ;;  %369 = vmatpush.msrb.mxu3 %v192_v22  ;;  %v91_v53 = vld [vmem:[#allocation5 + $0x50] sm:$0xff]  ;;  %v92_v55 = vld [vmem:[#allocation5 + $0x58] sm:$0xff]  ;;  %v433_v17 = vld [vmem:[#allocation8 + $0x160] sm:$0xff] }
  0x40   :  { %310 = vmatpush.msrb.mxu0 %v123_v19  ;;  %350 = vmatpush.msrb.mxu2 %v124_v21  ;;  %v159_v54 = vld [vmem:[#allocation5 + $0x270] sm:$0xff]  ;;  %v160_v56 = vld [vmem:[#allocation5 + $0x278] sm:$0xff] }
  0x41   :  { %330 = vmatpush.msrb.mxu1 %v187_v24  ;;  %370 = vmatpush.msrb.mxu3 %v188_v26  ;;  %v87_v57 = vld [vmem:[#allocation5 + $0x30] sm:$0xff]  ;;  %v88_v59 = vld [vmem:[#allocation5 + $0x38] sm:$0xff]  ;;  %v397_v26 = vld [vmem:[#allocation8 + $0x40] sm:$0xff] }
  0x42   :  { %311 = vmatpush.msrb.mxu0 %v119_v23  ;;  %351 = vmatpush.msrb.mxu2 %v120_v25  ;;  %v155_v58 = vld [vmem:[#allocation5 + $0x250] sm:$0xff]  ;;  %v156_v60 = vld [vmem:[#allocation5 + $0x258] sm:$0xff] }
  0x43   :  { %331 = vmatpush.msrb.mxu1 %v183_v28  ;;  %371 = vmatpush.msrb.mxu3 %v184_v30  ;;  %v83_v61 = vld [vmem:[#allocation5 + $0x10] sm:$0xff]  ;;  %v84_v63 = vld [vmem:[#allocation5 + $0x18] sm:$0xff]  ;;  %v413_v28 = vld [vmem:[#allocation8 + $0xc0] sm:$0xff] }
  0x44   :  { %312 = vmatpush.msrb.mxu0 %v115_v27  ;;  %352 = vmatpush.msrb.mxu2 %v116_v29  ;;  %v151_v62 = vld [vmem:[#allocation5 + $0x230] sm:$0xff]  ;;  %v152_v0 = vld [vmem:[#allocation5 + $0x238] sm:$0xff]  ;;  %v449_v30 = vld [vmem:[#allocation8 + $0x1e0] sm:$0xff] }
  0x45   :  { %332 = vmatpush.msrb.mxu1 %v179_v32  ;;  %372 = vmatpush.msrb.mxu3 %v180_v34  ;;  %v147_v1 = vld [vmem:[#allocation5 + $0x210] sm:$0xff]  ;;  %v148_v2 = vld [vmem:[#allocation5 + $0x218] sm:$0xff] }
  0x46   :  { %313 = vmatpush.msrb.mxu0 %v111_v31  ;;  %353 = vmatpush.msrb.mxu2 %v112_v33  ;;  %v404_v3 = vld [vmem:[#allocation8 + $0x78] sm:$0xff]  ;;  %v403_v7 = vld [vmem:[#allocation8 + $0x70] sm:$0xff]  ;;  %v402_v11 = vld [vmem:[#allocation8 + $0x68] sm:$0xff] }
  0x47   :  { %333 = vmatpush.msrb.mxu1 %v175_v36  ;;  %373 = vmatpush.msrb.mxu3 %v176_v38  ;;  %v420_v4 = vld [vmem:[#allocation8 + $0xf8] sm:$0xff]  ;;  %v419_v8 = vld [vmem:[#allocation8 + $0xf0] sm:$0xff]  ;;  %v418_v12 = vld [vmem:[#allocation8 + $0xe8] sm:$0xff] }
  0x48   :  { %314 = vmatpush.msrb.mxu0 %v107_v35  ;;  %354 = vmatpush.msrb.mxu2 %v108_v37  ;;  %v436_v5 = vld [vmem:[#allocation8 + $0x178] sm:$0xff]  ;;  %v435_v9 = vld [vmem:[#allocation8 + $0x170] sm:$0xff]  ;;  %v434_v13 = vld [vmem:[#allocation8 + $0x168] sm:$0xff] }
  0x49   :  { %334 = vmatpush.msrb.mxu1 %v171_v40  ;;  %374 = vmatpush.msrb.mxu3 %v172_v42  ;;  %v452_v6 = vld [vmem:[#allocation8 + $0x1f8] sm:$0xff]  ;;  %v451_v10 = vld [vmem:[#allocation8 + $0x1f0] sm:$0xff]  ;;  %v450_v14 = vld [vmem:[#allocation8 + $0x1e8] sm:$0xff] }
  0x4a   :  { %315 = vmatpush.msrb.mxu0 %v103_v39  ;;  %355 = vmatpush.msrb.mxu2 %v104_v41  ;;  %v400_v18 = vld [vmem:[#allocation8 + $0x58] sm:$0xff]  ;;  %v399_v21 = vld [vmem:[#allocation8 + $0x50] sm:$0xff]  ;;  %v398_v24 = vld [vmem:[#allocation8 + $0x48] sm:$0xff] }
  0x4b   :  { %335 = vmatpush.msrb.mxu1 %v167_v44  ;;  %375 = vmatpush.msrb.mxu3 %v168_v46  ;;  %v416_v19 = vld [vmem:[#allocation8 + $0xd8] sm:$0xff]  ;;  %v415_v22 = vld [vmem:[#allocation8 + $0xd0] sm:$0xff]  ;;  %v414_v25 = vld [vmem:[#allocation8 + $0xc8] sm:$0xff] }
  0x4c   :  { %316 = vmatpush.msrb.mxu0 %v99_v43  ;;  %356 = vmatpush.msrb.mxu2 %v100_v45  ;;  %v432_v20 = vld [vmem:[#allocation8 + $0x158] sm:$0xff]  ;;  %v431_v23 = vld [vmem:[#allocation8 + $0x150] sm:$0xff]  ;;  %v430_v29 = vld [vmem:[#allocation8 + $0x148] sm:$0xff] }
  0x4d   :  { %241 = vmatmul.f32.vlgmr.msra.gmra.mxu0 %v221_v47  ;;  %281 = vmatmul.f32.vlgmr.msra.gmra.mxu2 %v221_v47  ;;  %v396_v27 = vld [vmem:[#allocation8 + $0x38] sm:$0xff]  ;;  %v395_v31 = vld [vmem:[#allocation8 + $0x30] sm:$0xff]  ;;  %v429_v33 = vld [vmem:[#allocation8 + $0x140] sm:$0xff] }
  0x4e   :  { %317 = vmatpush.msrb.mxu0 %v95_v48  ;;  %336 = vmatpush.msrb.mxu1 %v163_v49  ;;  %v412_v32 = vld [vmem:[#allocation8 + $0xb8] sm:$0xff]  ;;  %v394_v35 = vld [vmem:[#allocation8 + $0x28] sm:$0xff]  ;;  %v411_v36 = vld [vmem:[#allocation8 + $0xb0] sm:$0xff] }
  0x4f   :  { %357 = vmatpush.msrb.mxu2 %v96_v50  ;;  %376 = vmatpush.msrb.mxu3 %v164_v51  ;;  %v448_v34 = vld [vmem:[#allocation8 + $0x1d8] sm:$0xff]  ;;  %v447_v38 = vld [vmem:[#allocation8 + $0x1d0] sm:$0xff]  ;;  %v393_v39 = vld [vmem:[#allocation8 + $0x20] sm:$0xff] }
  0x50   :  { %261 = vmatmul.f32.vlgmr.msra.gmra.mxu1 %v222_v52  ;;  %301 = vmatmul.f32.vlgmr.msra.gmra.mxu3 %v222_v52  ;;  %v428_v37 = vld [vmem:[#allocation8 + $0x138] sm:$0xff]  ;;  %v410_v40 = vld [vmem:[#allocation8 + $0xa8] sm:$0xff]  ;;  %v427_v41 = vld [vmem:[#allocation8 + $0x130] sm:$0xff] }
  0x51   :  { %318 = vmatpush.msrb.mxu0 %v91_v53  ;;  %337 = vmatpush.msrb.mxu1 %v159_v54  ;;  %v446_v42 = vld [vmem:[#allocation8 + $0x1c8] sm:$0xff]  ;;  %v392_v43 = vld [vmem:[#allocation8 + $0x18] sm:$0xff]  ;;  %v409_v44 = vld [vmem:[#allocation8 + $0xa0] sm:$0xff] }
  0x52   :  { %358 = vmatpush.msrb.mxu2 %v92_v55  ;;  %377 = vmatpush.msrb.mxu3 %v160_v56  ;;  %v426_v45 = vld [vmem:[#allocation8 + $0x128] sm:$0xff]  ;;  %v445_v46 = vld [vmem:[#allocation8 + $0x1c0] sm:$0xff]  ;;  %v408_v48 = vld [vmem:[#allocation8 + $0x98] sm:$0xff] }
  0x53   :  { %319 = vmatpush.msrb.mxu0 %v87_v57  ;;  %338 = vmatpush.msrb.mxu1 %v155_v58  ;;  %v425_v49 = vld [vmem:[#allocation8 + $0x120] sm:$0xff]  ;;  %v444_v50 = vld [vmem:[#allocation8 + $0x1b8] sm:$0xff]  ;;  %v390_v51 = vld [vmem:[#allocation8 + $0x8] sm:$0xff] }
  0x54   :  { %359 = vmatpush.msrb.mxu2 %v88_v59  ;;  %378 = vmatpush.msrb.mxu3 %v156_v60  ;;  %v424_v53 = vld [vmem:[#allocation8 + $0x118] sm:$0xff]  ;;  %v443_v54 = vld [vmem:[#allocation8 + $0x1b0] sm:$0xff]  ;;  %v389_v55 = vld [vmem:[#allocation8] sm:$0xff] }
  0x55   :  { %320 = vmatpush.msrb.mxu0 %v83_v61  ;;  %339 = vmatpush.msrb.mxu1 %v151_v62  ;;  %v406_v56 = vld [vmem:[#allocation8 + $0x88] sm:$0xff]  ;;  %v423_v57 = vld [vmem:[#allocation8 + $0x110] sm:$0xff]  ;;  %v405_v59 = vld [vmem:[#allocation8 + $0x80] sm:$0xff] }
  0x56   :  { %360 = vmatpush.msrb.mxu2 %v84_v63  ;;  %379 = vmatpush.msrb.mxu3 %v152_v0  ;;  %v442_v58 = vld [vmem:[#allocation8 + $0x1a8] sm:$0xff]  ;;  %v441_v61 = vld [vmem:[#allocation8 + $0x1a0] sm:$0xff]  ;;  %v440_v63 = vld [vmem:[#allocation8 + $0x198] sm:$0xff] }
  0x57   :  { %321 = vmatmul.f32.vlgmr.msrb.gmra.mxu0 %v221_v47  ;;  %361 = vmatmul.f32.vlgmr.msrb.gmra.mxu2 %v221_v47  ;;  %v391_v47 = vld [vmem:[#allocation8 + $0x10] sm:$0xff]  ;;  %v422_v60 = vld [vmem:[#allocation8 + $0x108] sm:$0xff]  ;;  %v421_v62 = vld [vmem:[#allocation8 + $0x100] sm:$0xff] }
  0x58   :  { %340 = vmatpush.msrb.mxu1 %v147_v1  ;;  %380 = vmatpush.msrb.mxu3 %v148_v2  ;;  %v439_v0 = vld [vmem:[#allocation8 + $0x190] sm:$0xff]  ;;  %v438_v1 = vld [vmem:[#allocation8 + $0x188] sm:$0xff]  ;;  %v437_v2 = vld [vmem:[#allocation8 + $0x180] sm:$0xff] }
  0x59   :  { %341 = vmatmul.f32.vlgmr.msrb.gmra.mxu1 %v222_v52  ;;  %381 = vmatmul.f32.vlgmr.msrb.gmra.mxu3 %v222_v52  ;;  %v407_v52 = vld [vmem:[#allocation8 + $0x90] sm:$0xff] }
  0x5a   :  { %457 = vmatpush.msra.mxu0 %v404_v3  ;;  %477 = vmatpush.msra.mxu1 %v420_v4  ;;  %v209_v3 = vld [vmem:[#allocation7] sm:$0xf] }
  0x5b   :  { %497 = vmatpush.msra.mxu2 %v436_v5  ;;  %517 = vmatpush.msra.mxu3 %v452_v6  ;;  %v211_v4 = vperm.slane %v209_v3, 0 }
  0x5c   :  { %458 = vmatpush.msra.mxu0 %v403_v7  ;;  %478 = vmatpush.msra.mxu1 %v419_v8  ;;  %v212_v8 = vperm.slane %v209_v3, 1 }
  0x5d   :  { %498 = vmatpush.msra.mxu2 %v435_v9  ;;  %518 = vmatpush.msra.mxu3 %v451_v10 }
  0x5e   :  { %459 = vmatpush.msra.mxu0 %v402_v11  ;;  %479 = vmatpush.msra.mxu1 %v418_v12  ;;  %v213_v12 = vperm.slane %v209_v3, 2 }
  0x5f   :  { %499 = vmatpush.msra.mxu2 %v434_v13  ;;  %519 = vmatpush.msra.mxu3 %v450_v14 }
  0x60   :  { %460 = vmatpush.msra.mxu0 %v401_v15  ;;  %480 = vmatpush.msra.mxu1 %v417_v16 }
  0x61   :  { %500 = vmatpush.msra.mxu2 %v433_v17  ;;  %520 = vmatpush.msra.mxu3 %v449_v30 }
  0x62   :  { %461 = vmatpush.msra.mxu0 %v400_v18  ;;  %481 = vmatpush.msra.mxu1 %v416_v19 }
  0x63   :  { %501 = vmatpush.msra.mxu2 %v432_v20  ;;  %521 = vmatpush.msra.mxu3 %v448_v34  ;;  %v214_v20 = vperm.slane %v209_v3, 3 }
  0x64   :  { %462 = vmatpush.msra.mxu0 %v399_v21  ;;  %482 = vmatpush.msra.mxu1 %v415_v22 }
  0x65   :  { %502 = vmatpush.msra.mxu2 %v431_v23  ;;  %522 = vmatpush.msra.mxu3 %v447_v38 }
  0x66   :  { %463 = vmatpush.msra.mxu0 %v398_v24  ;;  %483 = vmatpush.msra.mxu1 %v414_v25 }
  0x67   :  { %503 = vmatpush.msra.mxu2 %v430_v29  ;;  %523 = vmatpush.msra.mxu3 %v446_v42 }
  0x68   :  { %464 = vmatpush.msra.mxu0 %v397_v26  ;;  %484 = vmatpush.msra.mxu1 %v413_v28  ;;  %v566_v28 = vld [vmem:[%s764_s4] ss:$0 sm:$0xff] }
  0x69   :  { %504 = vmatpush.msra.mxu2 %v429_v33  ;;  %524 = vmatpush.msra.mxu3 %v445_v46 }
  0x6a   :  { %465 = vmatpush.msra.mxu0 %v396_v27  ;;  %485 = vmatpush.msra.mxu1 %v412_v32 }
  0x6b   :  { %505 = vmatpush.msra.mxu2 %v428_v37  ;;  %525 = vmatpush.msra.mxu3 %v444_v50 }
  0x6c   :  { %466 = vmatpush.msra.mxu0 %v395_v31  ;;  %486 = vmatpush.msra.mxu1 %v411_v36 }
  0x6d   :  { %506 = vmatpush.msra.mxu2 %v427_v41  ;;  %526 = vmatpush.msra.mxu3 %v443_v54 }
  0x6e   :  { %467 = vmatpush.msra.mxu0 %v394_v35  ;;  %487 = vmatpush.msra.mxu1 %v410_v40 }
  0x6f   :  { %507 = vmatpush.msra.mxu2 %v426_v45  ;;  %527 = vmatpush.msra.mxu3 %v442_v58 }
  0x70   :  { %468 = vmatpush.msra.mxu0 %v393_v39  ;;  %488 = vmatpush.msra.mxu1 %v409_v44 }
  0x71   :  { %508 = vmatpush.msra.mxu2 %v425_v49  ;;  %528 = vmatpush.msra.mxu3 %v441_v61 }
  0x72   :  { %469 = vmatpush.msra.mxu0 %v392_v43  ;;  %489 = vmatpush.msra.mxu1 %v408_v48 }
  0x73   :  { %509 = vmatpush.msra.mxu2 %v424_v53  ;;  %529 = vmatpush.msra.mxu3 %v440_v63 }
  0x74   :  { %470 = vmatpush.msra.mxu0 %v391_v47  ;;  %490 = vmatpush.msra.mxu1 %v407_v52 }
  0x75   :  { %510 = vmatpush.msra.mxu2 %v423_v57  ;;  %530 = vmatpush.msra.mxu3 %v439_v0 }
  0x76   :  { %471 = vmatpush.msra.mxu0 %v390_v51  ;;  %491 = vmatpush.msra.mxu1 %v406_v56 }
  0x77   :  { %511 = vmatpush.msra.mxu2 %v422_v60  ;;  %531 = vmatpush.msra.mxu3 %v438_v1 }
  0x78   :  { %472 = vmatpush.msra.mxu0 %v389_v55  ;;  %492 = vmatpush.msra.mxu1 %v405_v59 }
  0x79   :  { %512 = vmatpush.msra.mxu2 %v421_v62  ;;  %532 = vmatpush.msra.mxu3 %v437_v2 }
  0xca   :  { %v242_v5 = vpop.f32.mrf.mxu0 }
  0xcb   :  { %v243_v6 = vadd.f32 %v242_v5, %v211_v4 }
  0xcd   :  { %v262_v7 = vpop.f32.mrf.mxu1 }
  0xce   :  { %v263_v9 = vadd.f32 %v262_v7, %v243_v6 }
  0xd0   :  { %567 = vtanh.f32 %v263_v9  ;;  %v282_v10 = vpop.f32.mrf.mxu2 }
  0xd1   :  { %v283_v11 = vadd.f32 %v282_v10, %v212_v8 }
  0xd3   :  { %v302_v13 = vpop.f32.mrf.mxu3 }
  0xd4   :  { %v303_v14 = vadd.f32 %v302_v13, %v283_v11  ;;  %v322_v15 = vpop.f32.mrf.mxu0 }
  0xd5   :  { %v323_v16 = vadd.f32 %v322_v15, %v213_v12 }
  0xd6   :  { %v568_v17 = vpop.eup %567  ;;  %569 = vtanh.f32 %v303_v14  ;;  %v342_v18 = vpop.f32.mrf.mxu1 }
  0xd7   :  { %v343_v19 = vadd.f32 %v342_v18, %v323_v16  ;;  %473 = vmatmul.f32.vlgmr.msra.gmra.mxu0 %v568_v17 }
  0xd9   :  { %571 = vtanh.f32 %v343_v19 }
  0xda   :  { %v362_v21 = vpop.f32.mrf.mxu2 }
  0xdb   :  { %v363_v22 = vadd.f32 %v362_v21, %v214_v20 }
  0xdc   :  { %v570_v23 = vpop.eup %569  ;;  %v382_v24 = vpop.f32.mrf.mxu3 }
  0xdd   :  { %v383_v25 = vadd.f32 %v382_v24, %v363_v22  ;;  %493 = vmatmul.f32.vlgmr.msra.gmra.mxu1 %v570_v23 }
  0xdf   :  { %v572_v26 = vpop.eup %571  ;;  %573 = vtanh.f32 %v383_v25 }
  0xe0   :  { %513 = vmatmul.f32.vlgmr.msra.gmra.mxu2 %v572_v26 }
  0xe5   :  { %v574_v27 = vpop.eup %573 }
  0xe6   :  { %533 = vmatmul.f32.vlgmr.msra.gmra.mxu3 %v574_v27 }
 0x154   :  { %v474_v29 = vpop.f32.mrf.mxu0 }
 0x155   :  { %v475_v30 = vadd.f32 %v566_v28, %v474_v29 }
 0x15a   :  { %v494_v31 = vpop.f32.mrf.mxu1 }
 0x15b   :  { %v495_v33 = vadd.f32 %v494_v31, %v475_v30 }
 0x163   :  { %v514_v32 = vpop.f32.mrf.mxu2 }
 0x164   :  { %v515_v34 = vadd.f32 %v514_v32, %v495_v33 }
 0x169   :  { %v534_v35 = vpop.f32.mrf.mxu3 }
 0x16a   :  { %v535_v36 = vadd.f32 %v534_v35, %v515_v34 }
 0x16c   :  { %537 = vst [vmem:[#allocation10] sm:$0x7] %v535_v36 }
 0x16d   :  { %548 = dma.vmem_to_hbm [thread:$0]  %s544_s16, 64, %s546_s19, [#allocation4]  }
 0x16e   :  { %701 = dma.done.wait [#allocation4], 64  }
 0x16f   :  { %702 = vsyncadd [#allocation4], 4294967232 }
 0x170   :  { %553 = vsyncpa [#allocation3], 1 }
 0x171   :  { %554 = vsyncpa [#allocation6], 1 }
 0x172   :  { %555 = vsyncpa [#allocation9], 1 }
 0x173   :  { %556 = vsyncpa [#allocation4], 1 }

</bundles_post_ra>
